<compile_context>
chip_gen: v6e
topology: v6e:2x2x1
jax: 0.10.0
libtpu: 0.0.40
codegen_flags: <defaults>
</compile_context>

<pallas_src>
import functools

import jax
import jax.numpy as jnp
from jax.experimental import pallas as pl
from jax.experimental.pallas import tpu as pltpu

_LANE = 128      # vreg lane width (last-dim alignment)
_SUBLANE = 8     # vreg sublane count (second-to-last dim alignment)


def _round_up(x, m):
    return (x + m - 1) // m * m


@functools.lru_cache(maxsize=1)
def _vmem_capacity_bytes():
    """Generation-aware VMEM capacity (64 MiB on v7x, 128 MiB on v5e/v6e)."""
    try:
        cap = int(getattr(pltpu.get_tpu_info(), "vmem_capacity_bytes", 0))
        if cap > 0:
            return cap
    except Exception:
        pass
    return 64 * 1024 * 1024  # conservative fallback (v7x per-core VMEM)


def _choose_tm(n, budget_bytes):
    """Row-tile size for A: a multiple of 256 when tiled (fills the 256-wide
    MXU on v6e/v7x), shrunk if the double-buffered A tiles would dominate the
    VMEM budget.  For small N the whole thing is a single tile."""
    n8 = _round_up(n, _SUBLANE)
    if n8 <= 512:
        return n8                       # single tile; one grid step
    tm = 512
    while tm > 64 and 2 * tm * _round_up(n, tm) * 2 > budget_bytes // 2:
        tm //= 2
    return tm


def _gcn_layer_kernel(x_ref, w_ref, a_ref, out_ref, *, apply_relu):
    """One GCN layer on one row tile of A:  out_rows = A_rows @ (X @ W).

    X and W are VMEM-resident across the whole grid (constant index maps);
    only the A row tile streams from HBM.  Both matmuls run on the MXU with
    bf16 operands and f32 accumulation; the relu runs on the VPU.
    """
    support = jnp.dot(x_ref[...], w_ref[...],
                      preferred_element_type=jnp.float32)
    out = jnp.dot(a_ref[...], support.astype(a_ref.dtype),
                  preferred_element_type=jnp.float32)
    if apply_relu:
        out = jnp.maximum(out, 0.0)
    out_ref[...] = out.astype(out_ref.dtype)


def _gcn_layer(x, w, a, *, apply_relu, out_dtype, tm, n_true, h_true,
               budget_bytes, vmem_cap):
    """out = [relu](A @ (x @ w)) with A row-tiled over the grid."""
    n_pad, f = x.shape
    h = w.shape[1]
    assert a.shape == (n_pad, n_pad) and n_pad % tm == 0

    out_itemsize = jnp.dtype(out_dtype).itemsize
    footprint = (
        x.size * x.dtype.itemsize            # X, VMEM-resident
        + w.size * w.dtype.itemsize          # W, VMEM-resident
        + 2 * tm * n_pad * a.dtype.itemsize  # A row tile, double-buffered
        + 2 * tm * h * out_itemsize          # out tile, double-buffered
        + n_pad * h * 4                      # f32 support temp
        + tm * h * 4                         # f32 A@support temp
    )
    assert footprint <= budget_bytes, (
        f"GCN layer VMEM footprint {footprint} B exceeds budget "
        f"{budget_bytes} B; reduce N or the row tile size")
    vmem_limit = min(int(footprint * 1.3) + (2 << 20), vmem_cap)

    # CostEstimate from true (unpadded) dims.
    flops = 2 * (n_true * f * h_true + n_true * n_true * h_true)
    bytes_accessed = (x.size * x.dtype.itemsize + w.size * w.dtype.itemsize
                      + a.size * a.dtype.itemsize + n_pad * h * out_itemsize)

    return pl.pallas_call(
        functools.partial(_gcn_layer_kernel, apply_relu=apply_relu),
        out_shape=jax.ShapeDtypeStruct((n_pad, h), out_dtype),
        grid=(n_pad // tm,),
        in_specs=[
            pl.BlockSpec((n_pad, f), lambda i: (0, 0)),   # X (resident)
            pl.BlockSpec((f, h), lambda i: (0, 0)),       # W (resident)
            pl.BlockSpec((tm, n_pad), lambda i: (i, 0)),  # A row tile (streamed)
        ],
        out_specs=pl.BlockSpec((tm, h), lambda i: (i, 0)),
        compiler_params=pltpu.CompilerParams(
            dimension_semantics=("parallel",),
            vmem_limit_bytes=vmem_limit),
        cost_estimate=pl.CostEstimate(
            flops=flops, transcendentals=0, bytes_accessed=bytes_accessed),
    )(x, w, a)


@jax.jit
def gcn_forward(x, w1, w2, a_norm):
    """GCN.forward(x, A_norm) in eval mode."""
    n, nfeat = x.shape
    nhid = w1.shape[1]
    nclass = w2.shape[1]
    del nfeat

    vmem_cap = _vmem_capacity_bytes()
    budget = int(vmem_cap * 0.75)
    tm = _choose_tm(n, budget)
    n_pad = _round_up(n, tm)

    bf16 = jnp.bfloat16
    # Only A (and x) rows/cols are padded to the row-tile granularity; zero
    # rows/cols are exact for matmul + relu.  Feature dims stay unpadded.
    x_p = jnp.pad(x, ((0, n_pad - n), (0, 0))).astype(bf16)
    a_p = jnp.pad(a_norm, ((0, n_pad - n), (0, n_pad - n))).astype(bf16)
    w1_b = w1.astype(bf16)
    # Pad only the *final* output lane dim (nclass) to 128 for unmasked vst;
    # zero weight columns are exact and get sliced off below.
    c_pad = _round_up(nclass, _LANE)
    w2_p = jnp.pad(w2, ((0, 0), (0, c_pad - nclass))).astype(bf16)

    # Layer 1: h1 = relu(A @ (x @ W1)), kept in bf16 for the next MXU pass.
    h1 = _gcn_layer(x_p, w1_b, a_p, apply_relu=True, out_dtype=bf16,
                    tm=tm, n_true=n, h_true=nhid,
                    budget_bytes=budget, vmem_cap=vmem_cap)

    # Dropout (p=0.5) is identity in eval mode.

    # Layer 2: out = A @ (h1 @ W2), f32 output.
    out = _gcn_layer(h1, w2_p, a_p, apply_relu=False, out_dtype=jnp.float32,
                     tm=tm, n_true=n, h_true=nclass,
                     budget_bytes=budget, vmem_cap=vmem_cap)

    return out[:n, :nclass]


# ---------------------------------------------------------------------------
# Glue: deterministic parameter init + adjacency normalization (plain JAX).
# ---------------------------------------------------------------------------
def xavier_uniform(key, fan_in, fan_out, dtype=jnp.float32):
    """Matches nn.init.xavier_uniform_ (gain=1)."""
    limit = jnp.sqrt(6.0 / (fan_in + fan_out))
    return jax.random.uniform(
        key, (fan_in, fan_out), dtype=dtype, minval=-limit, maxval=limit
    )


def normalize_adj(a):
    """A_norm = D^{-1/2} (A + I) D^{-1/2}, same as the PyTorch reference."""
    n = a.shape[0]
    a_hat = a + jnp.eye(n, dtype=a.dtype)
    d = jnp.sum(a_hat, axis=1)
    d_inv_sqrt = jnp.power(d, -0.5)
    return (d_inv_sqrt[:, None] * a_hat) * d_inv_sqrt[None, :]


def reference_forward(x, w1, w2, a_norm, operand_dtype=jnp.float32):
    """Pure-JAX reference of the PyTorch forward (eval mode)."""
    cast = lambda v: v.astype(operand_dtype)
    s1 = jnp.dot(cast(x), cast(w1), preferred_element_type=jnp.float32)
    h1 = jax.nn.relu(jnp.dot(cast(a_norm), cast(s1),
                             preferred_element_type=jnp.float32))
    s2 = jnp.dot(cast(h1), cast(w2), preferred_element_type=jnp.float32)
    return jnp.dot(cast(a_norm), cast(s2), preferred_element_type=jnp.float32)


if __name__ == "__main__":
    # Small shapes consistent with the module: N nodes, nfeat -> nhid -> nclass.
    N, NFEAT, NHID, NCLASS = 64, 16, 32, 8

    key = jax.random.PRNGKey(0)
    k_x, k_a, k_w1, k_w2 = jax.random.split(key, 4)

    # Node features.
    x = jax.random.normal(k_x, (N, NFEAT), dtype=jnp.float32)

    # Random symmetric binary adjacency (no self-loops), then normalize.
    a_raw = (jax.random.uniform(k_a, (N, N)) < 0.1).astype(jnp.float32)
    a_sym = jnp.maximum(a_raw, a_raw.T)
    a_sym = a_sym * (1.0 - jnp.eye(N, dtype=jnp.float32))
    a_norm = normalize_adj(a_sym)

    # GCN parameters (xavier uniform, deterministic).
    w1 = xavier_uniform(k_w1, NFEAT, NHID)
    w2 = xavier_uniform(k_w2, NHID, NCLASS)

    out = jax.block_until_ready(gcn_forward(x, w1, w2, a_norm))
    assert out.shape == (N, NCLASS)

    # Strict check against a reference using the same bf16 operand precision.
    ref_bf16 = reference_forward(x, w1, w2, a_norm, operand_dtype=jnp.bfloat16)
    assert jnp.allclose(out, ref_bf16, atol=2e-3, rtol=2e-3)

    # Loose sanity check against the full-f32 reference (bf16 operand noise).
    ref_f32 = reference_forward(x, w1, w2, a_norm, operand_dtype=jnp.float32)
    assert jnp.allclose(out, ref_f32, atol=5e-2, rtol=5e-2)

    print("KERNEL_OK")
</pallas_src>

<mosaic_0001>
module attributes {stable_mosaic.version = 11 : i64} {
  func.func @_gcn_layer_kernel(%arg0: i32, %arg1: memref<64x32xbf16, #tpu.memory_space<vmem>>, %arg2: memref<32x128xbf16, #tpu.memory_space<vmem>>, %arg3: memref<64x64xbf16, #tpu.memory_space<vmem>>, %arg4: memref<64x128xf32, #tpu.memory_space<vmem>>) attributes {dimension_semantics = [#tpu.dimension_semantics<parallel>], iteration_bounds = array<i64: 1>, scalar_prefetch = 0 : i64, scratch_operands = 0 : i64, tpu.core_type = #tpu.core_type<tc>, window_params = [{pipeline_mode = #tpu.pipeline_mode<synchronous>, transform_indices = @transform_0, window_bounds = array<i64: 64, 32>}, {pipeline_mode = #tpu.pipeline_mode<synchronous>, transform_indices = @transform_1, window_bounds = array<i64: 32, 128>}, {transform_indices = @transform_2, window_bounds = array<i64: 64, 64>}, {transform_indices = @transform_3, window_bounds = array<i64: 64, 128>}]} {
    %c0 = arith.constant 0 : index
    %c0_0 = arith.constant 0 : index
    %0 = vector.load %arg1[%c0, %c0_0] : memref<64x32xbf16, #tpu.memory_space<vmem>>, vector<64x32xbf16>
    %c0_1 = arith.constant 0 : index
    %c0_2 = arith.constant 0 : index
    %1 = vector.load %arg2[%c0_1, %c0_2] : memref<32x128xbf16, #tpu.memory_space<vmem>>, vector<32x128xbf16>
    %cst = arith.constant dense<0.000000e+00> : vector<64x128xf32>
    %2 = tpu.matmul %0, %1, %cst {dimension_numbers = #tpu.dot_dimension_numbers<[1], [0], [0], [1], [0, 0, 1, 1], [], []>} : vector<64x32xbf16>, vector<32x128xbf16>, vector<64x128xf32> -> vector<64x128xf32>
    %c0_3 = arith.constant 0 : index
    %c0_4 = arith.constant 0 : index
    %3 = vector.load %arg3[%c0_3, %c0_4] : memref<64x64xbf16, #tpu.memory_space<vmem>>, vector<64x64xbf16>
    %4 = arith.truncf %2 : vector<64x128xf32> to vector<64x128xbf16>
    %cst_5 = arith.constant dense<0.000000e+00> : vector<64x128xf32>
    %5 = tpu.matmul %3, %4, %cst_5 {dimension_numbers = #tpu.dot_dimension_numbers<[1], [0], [0], [1], [0, 0, 1, 1], [], []>} : vector<64x64xbf16>, vector<64x128xbf16>, vector<64x128xf32> -> vector<64x128xf32>
    %c0_6 = arith.constant 0 : index
    %c0_7 = arith.constant 0 : index
    %6 = vector.load %arg4[%c0_6, %c0_7] : memref<64x128xf32, #tpu.memory_space<vmem>>, vector<64x128xf32>
    tpu.vector_store %arg4[%c0_6, %c0_7], %5 {strides = array<i32>} : memref<64x128xf32, #tpu.memory_space<vmem>>, vector<64x128xf32>,
    return
  }
  func.func @transform_0(%arg0: i32) -> (i32, i32) {
    %c0_i32 = arith.constant 0 : i32
    %c0_i32_0 = arith.constant 0 : i32
    %c0_i32_1 = arith.constant 0 : i32
    return %c0_i32, %c0_i32_0 : i32, i32
  }
  func.func @transform_1(%arg0: i32) -> (i32, i32) {
    %c0_i32 = arith.constant 0 : i32
    %c0_i32_0 = arith.constant 0 : i32
    %c0_i32_1 = arith.constant 0 : i32
    return %c0_i32, %c0_i32_0 : i32, i32
  }
  func.func @transform_2(%arg0: i32) -> (i32, i32) {
    %c0_i32 = arith.constant 0 : i32
    %c0_i32_0 = arith.constant 0 : i32
    return %arg0, %c0_i32 : i32, i32
  }
  func.func @transform_3(%arg0: i32) -> (i32, i32) {
    %c0_i32 = arith.constant 0 : i32
    %c0_i32_0 = arith.constant 0 : i32
    return %arg0, %c0_i32 : i32, i32
  }
}

module attributes {stable_mosaic.version = 11 : i64} {
  func.func @_gcn_layer_kernel(%arg0: i32, %arg1: memref<64x16xbf16, #tpu.memory_space<vmem>>, %arg2: memref<16x32xbf16, #tpu.memory_space<vmem>>, %arg3: memref<64x64xbf16, #tpu.memory_space<vmem>>, %arg4: memref<64x32xbf16, #tpu.memory_space<vmem>>) attributes {dimension_semantics = [#tpu.dimension_semantics<parallel>], iteration_bounds = array<i64: 1>, scalar_prefetch = 0 : i64, scratch_operands = 0 : i64, tpu.core_type = #tpu.core_type<tc>, window_params = [{pipeline_mode = #tpu.pipeline_mode<synchronous>, transform_indices = @transform_0, window_bounds = array<i64: 64, 16>}, {pipeline_mode = #tpu.pipeline_mode<synchronous>, transform_indices = @transform_1, window_bounds = array<i64: 16, 32>}, {transform_indices = @transform_2, window_bounds = array<i64: 64, 64>}, {transform_indices = @transform_3, window_bounds = array<i64: 64, 32>}]} {
    %c0 = arith.constant 0 : index
    %c0_0 = arith.constant 0 : index
    %0 = vector.load %arg1[%c0, %c0_0] : memref<64x16xbf16, #tpu.memory_space<vmem>>, vector<64x16xbf16>
    %c0_1 = arith.constant 0 : index
    %c0_2 = arith.constant 0 : index
    %1 = vector.load %arg2[%c0_1, %c0_2] : memref<16x32xbf16, #tpu.memory_space<vmem>>, vector<16x32xbf16>
    %cst = arith.constant dense<0.000000e+00> : vector<64x32xf32>
    %2 = tpu.matmul %0, %1, %cst {dimension_numbers = #tpu.dot_dimension_numbers<[1], [0], [0], [1], [0, 0, 1, 1], [], []>} : vector<64x16xbf16>, vector<16x32xbf16>, vector<64x32xf32> -> vector<64x32xf32>
    %c0_3 = arith.constant 0 : index
    %c0_4 = arith.constant 0 : index
    %3 = vector.load %arg3[%c0_3, %c0_4] : memref<64x64xbf16, #tpu.memory_space<vmem>>, vector<64x64xbf16>
    %4 = arith.truncf %2 : vector<64x32xf32> to vector<64x32xbf16>
    %cst_5 = arith.constant dense<0.000000e+00> : vector<64x32xf32>
    %5 = tpu.matmul %3, %4, %cst_5 {dimension_numbers = #tpu.dot_dimension_numbers<[1], [0], [0], [1], [0, 0, 1, 1], [], []>} : vector<64x64xbf16>, vector<64x32xbf16>, vector<64x32xf32> -> vector<64x32xf32>
    %cst_6 = arith.constant 0.000000e+00 : f32
    %6 = vector.broadcast %cst_6 : f32 to vector<64x32xf32>
    %7 = arith.maximumf %5, %6 : vector<64x32xf32>
    %8 = arith.truncf %7 : vector<64x32xf32> to vector<64x32xbf16>
    %c0_7 = arith.constant 0 : index
    %c0_8 = arith.constant 0 : index
    %9 = vector.load %arg4[%c0_7, %c0_8] : memref<64x32xbf16, #tpu.memory_space<vmem>>, vector<64x32xbf16>
    tpu.vector_store %arg4[%c0_7, %c0_8], %8 {strides = array<i32>} : memref<64x32xbf16, #tpu.memory_space<vmem>>, vector<64x32xbf16>,
    return
  }
  func.func @transform_0(%arg0: i32) -> (i32, i32) {
    %c0_i32 = arith.constant 0 : i32
    %c0_i32_0 = arith.constant 0 : i32
    %c0_i32_1 = arith.constant 0 : i32
    return %c0_i32, %c0_i32_0 : i32, i32
  }
  func.func @transform_1(%arg0: i32) -> (i32, i32) {
    %c0_i32 = arith.constant 0 : i32
    %c0_i32_0 = arith.constant 0 : i32
    %c0_i32_1 = arith.constant 0 : i32
    return %c0_i32, %c0_i32_0 : i32, i32
  }
  func.func @transform_2(%arg0: i32) -> (i32, i32) {
    %c0_i32 = arith.constant 0 : i32
    %c0_i32_0 = arith.constant 0 : i32
    return %arg0, %c0_i32 : i32, i32
  }
  func.func @transform_3(%arg0: i32) -> (i32, i32) {
    %c0_i32 = arith.constant 0 : i32
    %c0_i32_0 = arith.constant 0 : i32
    return %arg0, %c0_i32 : i32, i32
  }
}

</mosaic_0001>

<bundles_post_ra>
// kernel: gcn_forward.2
= control target key start
LH: loop header
LB: loop body
LE: loop exit
PB: predicated region body
PF: predicated region fallthrough
CT: control target
= control target key end

     0   :  { %vm51_vm0 = vcmask 130048   ;;  %vm161_vm1 = vcmask 523264   ;;  %vm279_vm2 = vcmask 257024   ;;  %s464_s1 = inlined_call_operand.vmem [shape: bf16[16,32], index: 1, kind: input, shape index: {}]   ;;  %s465_s0 = inlined_call_operand.vmem [shape: bf16[64,16], index: 0, kind: input, shape index: {}]   ;;  %s466_s2 = inlined_call_operand.vmem [shape: bf16[64,64], index: 2, kind: input, shape index: {}]   ;;  %s467_s3 = inlined_call_operand.vmem [shape: bf16[64,32], index: 3, kind: output, shape index: {}]  }
   0x1   :  { %v372_v0 = vld [vmem:[%s464_s1] sm:$0xff]   ;;  %v374_v2 = vld [vmem:[%s465_s0 + $0x8] sm:$0xff]   ;;  %v375_v3 = vld [vmem:[%s465_s0 + $0x10] sm:$0xff]  }
   0x2   :  { %v373_v1 = vld [vmem:[%s465_s0] sm:$0xff]   ;;  %338 = vmatprep.subr.bf16.mxu0 %v372_v0  ;;  %v376_v4 = vld [vmem:[%s465_s0 + $0x18] sm:$0xff]   ;;  %v378_v6 = vld [vmem:[%s466_s2 + $0x10] sm:$0xff]  }
   0x3   :  { %339 = vmatpush3.bf16.msra.mxu0 %v372_v0  ;;  %340 = vmatprep.mubr.msk.bf16.mxu0 %vm51_vm0, %v373_v1  ;;  %v377_v5 = vld [vmem:[%s466_s2] sm:$0xff]   ;;  %v379_v19 = vld [vmem:[%s466_s2 + $0x8] sm:$0xff]   ;;  %v380_v20 = vld [vmem:[%s466_s2 + $0x18] sm:$0xff]  }
   0x4   :  { %360 = vmatprep.mubr.msk.bf16.mxu1 %vm161_vm1, %v378_v6 }
   0x6   :  { %341 = vmatmul.mubr.msk.bf16.vlgmr.msra.gmra.mxu0 %vm51_vm0, %v374_v2 }
   0x7   :  { %344 = vmatprep.mubr.msk.bf16.mxu0 %vm51_vm0, %v375_v3 }
   0xe   :  { %345 = vmatmul.mubr.msk.bf16.gmra.mxu0 %vm51_vm0, %v376_v4 }
   0xf   :  { %356 = vmatprep.mubr.msk.bf16.mxu0 %vm161_vm1, %v377_v5 }
  0xc6   :  { %v342_v7 = vpop.f32.mrf.mxu0 }
  0xc8   :  { %v98_v8 = vpop.f32.mrf.mxu0 }
  0xca   :  { %v343_v9 = vpop.f32.mrf.mxu0 }
  0xcb   :  { %v138_v17 = vpack.c.bf16 %v343_v9, %v342_v7 }
  0xcc   :  { %v101_v10 = vpop.f32.mrf.mxu0 }
  0xcd   :  { %v137_v18 = vpack.c.bf16 %v101_v10, %v98_v8 }
  0xce   :  { %v346_v11 = vpop.f32.mrf.mxu0 }
  0xd0   :  { %v114_v12 = vpop.f32.mrf.mxu0 }
  0xd2   :  { %v347_v13 = vpop.f32.mrf.mxu0 }
  0xd3   :  { %v140_v14 = vpack.c.bf16 %v347_v13, %v346_v11 }
  0xd4   :  { %v117_v15 = vpop.f32.mrf.mxu0 }
  0xd5   :  { %v139_v16 = vpack.c.bf16 %v117_v15, %v114_v12  ;;  %348 = vmatprep.subr.bf16.mxu0 %v140_v14  ;;  %364 = vmatprep.subr.bf16.mxu1 %v140_v14 }
  0xd6   :  { %349 = vmatpush3.bf16.msra.mxu0 %v140_v14  ;;  %368 = vmatpush3.bf16.msra.mxu1 %v140_v14 }
  0xd7   :  { %350 = vmatprep.subr.bf16.mxu0 %v139_v16  ;;  %365 = vmatprep.subr.bf16.mxu1 %v139_v16 }
  0xda   :  { %351 = vmatpush3.bf16.msra.mxu0 %v139_v16  ;;  %369 = vmatpush3.bf16.msra.mxu1 %v139_v16 }
  0xdb   :  { %352 = vmatprep.subr.bf16.mxu0 %v138_v17  ;;  %366 = vmatprep.subr.bf16.mxu1 %v138_v17 }
  0xde   :  { %353 = vmatpush3.bf16.msra.mxu0 %v138_v17  ;;  %370 = vmatpush3.bf16.msra.mxu1 %v138_v17 }
  0xdf   :  { %354 = vmatprep.subr.bf16.mxu0 %v137_v18  ;;  %367 = vmatprep.subr.bf16.mxu1 %v137_v18 }
  0xe2   :  { %355 = vmatpush3.bf16.msra.mxu0 %v137_v18  ;;  %371 = vmatpush3.bf16.msra.mxu1 %v137_v18 }
  0xe5   :  { %357 = vmatmul.mubr.msk.bf16.vlgmr.msra.gmra.mxu0 %vm161_vm1, %v379_v19  ;;  %361 = vmatmul.mubr.msk.bf16.vlgmr.msra.gmra.mxu1 %vm161_vm1, %v380_v20 }
 0x1a5   :  { %v358_v21 = vpop.f32.mrf.mxu0  ;;  %v362_v22 = vpop.f32.mrf.mxu1 }
 0x1a6   :  { %v241_v23 = vmax.f32 %v358_v21, 0.0  ;;  %v245_v24 = vmax.f32 %v362_v22, 0.0 }
 0x1a7   :  { %v208_v25 = vpop.f32.mrf.mxu0  ;;  %v224_v26 = vpop.f32.mrf.mxu1 }
 0x1a8   :  { %v319_v27 = vpack.c.bf16 %v241_v23, %v241_v23  ;;  %v323_v28 = vpack.c.bf16 %v245_v24, %v245_v24  ;;  %v239_v29 = vmax.f32 %v208_v25, 0.0  ;;  %v243_v30 = vmax.f32 %v224_v26, 0.0 }
 0x1a9   :  { %v359_v31 = vpop.f32.mrf.mxu0  ;;  %v363_v32 = vpop.f32.mrf.mxu1 }
 0x1aa   :  { %282 = vst.msk [vmem:[%s467_s3 + $0x8] sm:$0xf] %vm279_vm2, %v319_v27  ;;  %286 = vst.msk [vmem:[%s467_s3 + $0x18] sm:$0xf] %vm279_vm2, %v323_v28  ;;  %v317_v33 = vpack.c.bf16 %v239_v29, %v239_v29  ;;  %v321_v34 = vpack.c.bf16 %v243_v30, %v243_v30  ;;  %v242_v35 = vmax.f32 %v359_v31, 0.0  ;;  %v246_v36 = vmax.f32 %v363_v32, 0.0 }
 0x1ab   :  { %v211_v37 = vpop.f32.mrf.mxu0  ;;  %v227_v38 = vpop.f32.mrf.mxu1 }
 0x1ac   :  { %280 = vst.msk [vmem:[%s467_s3] sm:$0xf] %vm279_vm2, %v317_v33  ;;  %284 = vst.msk [vmem:[%s467_s3 + $0x10] sm:$0xf] %vm279_vm2, %v321_v34  ;;  %v320_v39 = vpack.c.bf16 %v242_v35, %v242_v35  ;;  %v324_v40 = vpack.c.bf16 %v246_v36, %v246_v36  ;;  %v240_v41 = vmax.f32 %v211_v37, 0.0  ;;  %v244_v42 = vmax.f32 %v227_v38, 0.0 }
 0x1ae   :  { %283 = vst.msk [vmem:[%s467_s3 + $0xc] sm:$0xf] %vm279_vm2, %v320_v39  ;;  %287 = vst.msk [vmem:[%s467_s3 + $0x1c] sm:$0xf] %vm279_vm2, %v324_v40  ;;  %v318_v43 = vpack.c.bf16 %v240_v41, %v240_v41  ;;  %v322_v44 = vpack.c.bf16 %v244_v42, %v244_v42 }
 0x1b0   :  { %281 = vst.msk [vmem:[%s467_s3 + $0x4] sm:$0xf] %vm279_vm2, %v318_v43  ;;  %285 = vst.msk [vmem:[%s467_s3 + $0x14] sm:$0xf] %vm279_vm2, %v322_v44 }

// kernel: gcn_forward.3
= control target key start
LH: loop header
LB: loop body
LE: loop exit
PB: predicated region body
PF: predicated region fallthrough
CT: control target
= control target key end

     0   :  { %vm59_vm0 = vcmask 261120   ;;  %vm169_vm1 = vcmask 523264   ;;  %s407_s1 = inlined_call_operand.vmem [shape: bf16[32,128], index: 1, kind: input, shape index: {}]   ;;  %s408_s0 = inlined_call_operand.vmem [shape: bf16[64,32], index: 0, kind: input, shape index: {}]   ;;  %s409_s2 = inlined_call_operand.vmem [shape: bf16[64,64], index: 2, kind: input, shape index: {}]   ;;  %s410_s3 = inlined_call_operand.vmem [shape: f32[64,128], index: 3, kind: output, shape index: {}]  }
   0x1   :  { %v319_v0 = vld [vmem:[%s407_s1 + $0x8] sm:$0xff]   ;;  %v320_v1 = vld [vmem:[%s407_s1] sm:$0xff]   ;;  %v323_v4 = vld [vmem:[%s408_s0 + $0x10] sm:$0xff]  }
   0x2   :  { %291 = vmatprep.subr.bf16.mxu0 %v319_v0  ;;  %v321_v2 = vld [vmem:[%s408_s0] sm:$0xff]   ;;  %v322_v3 = vld [vmem:[%s408_s0 + $0x8] sm:$0xff]   ;;  %v324_v5 = vld [vmem:[%s408_s0 + $0x18] sm:$0xff]  }
   0x3   :  { %292 = vmatpush3.bf16.msra.mxu0 %v319_v0  ;;  %295 = vmatprep.mubr.msk.bf16.mxu0 %vm59_vm0, %v321_v2  ;;  %v325_v6 = vld [vmem:[%s409_s2] sm:$0xff]   ;;  %v326_v19 = vld [vmem:[%s409_s2 + $0x8] sm:$0xff]   ;;  %v327_v20 = vld [vmem:[%s409_s2 + $0x10] sm:$0xff]  }
   0x4   :  { %293 = vmatprep.subr.bf16.mxu0 %v320_v1  ;;  %311 = vmatprep.mubr.msk.bf16.mxu1 %vm169_vm1, %v325_v6  ;;  %v328_v21 = vld [vmem:[%s409_s2 + $0x18] sm:$0xff]  }
   0x7   :  { %294 = vmatpush3.bf16.msra.mxu0 %v320_v1 }
   0xa   :  { %296 = vmatmul.mubr.msk.bf16.vlgmr.msra.gmra.mxu0 %vm59_vm0, %v322_v3 }
   0xb   :  { %299 = vmatprep.mubr.msk.bf16.mxu0 %vm59_vm0, %v323_v4 }
  0x12   :  { %300 = vmatmul.mubr.msk.bf16.gmra.mxu0 %vm59_vm0, %v324_v5 }
  0xca   :  { %v297_v7 = vpop.f32.mrf.mxu0 }
  0xcc   :  { %v106_v8 = vpop.f32.mrf.mxu0 }
  0xce   :  { %v298_v9 = vpop.f32.mrf.mxu0 }
  0xcf   :  { %v146_v17 = vpack.c.bf16 %v298_v9, %v297_v7 }
  0xd0   :  { %v109_v10 = vpop.f32.mrf.mxu0 }
  0xd1   :  { %v145_v18 = vpack.c.bf16 %v109_v10, %v106_v8 }
  0xd2   :  { %v301_v11 = vpop.f32.mrf.mxu0 }
  0xd4   :  { %v122_v12 = vpop.f32.mrf.mxu0 }
  0xd6   :  { %v302_v13 = vpop.f32.mrf.mxu0 }
  0xd7   :  { %v148_v14 = vpack.c.bf16 %v302_v13, %v301_v11 }
  0xd8   :  { %v125_v15 = vpop.f32.mrf.mxu0 }
  0xd9   :  { %v147_v16 = vpack.c.bf16 %v125_v15, %v122_v12  ;;  %303 = vmatprep.subr.bf16.mxu1 %v148_v14 }
  0xda   :  { %304 = vmatpush3.bf16.msra.mxu1 %v148_v14 }
  0xdb   :  { %305 = vmatprep.subr.bf16.mxu1 %v147_v16 }
  0xde   :  { %306 = vmatpush3.bf16.msra.mxu1 %v147_v16 }
  0xdf   :  { %307 = vmatprep.subr.bf16.mxu1 %v146_v17 }
  0xe2   :  { %308 = vmatpush3.bf16.msra.mxu1 %v146_v17 }
  0xe3   :  { %309 = vmatprep.subr.bf16.mxu1 %v145_v18 }
  0xe6   :  { %310 = vmatpush3.bf16.msra.mxu1 %v145_v18 }
  0xe9   :  { %312 = vmatmul.mubr.msk.bf16.vlgmr.msra.gmra.mxu1 %vm169_vm1, %v326_v19 }
  0xea   :  { %315 = vmatprep.mubr.msk.bf16.mxu1 %vm169_vm1, %v327_v20 }
  0xf1   :  { %316 = vmatmul.mubr.msk.bf16.gmra.mxu1 %vm169_vm1, %v328_v21 }
 0x1a9   :  { %v313_v22 = vpop.f32.mrf.mxu1 }
 0x1aa   :  { %249 = vst [vmem:[%s410_s3 + $0x10] sm:$0xff] %v313_v22 }
 0x1ab   :  { %v216_v23 = vpop.f32.mrf.mxu1 }
 0x1ac   :  { %247 = vst [vmem:[%s410_s3] sm:$0xff] %v216_v23 }
 0x1ad   :  { %v314_v24 = vpop.f32.mrf.mxu1 }
 0x1ae   :  { %250 = vst [vmem:[%s410_s3 + $0x18] sm:$0xff] %v314_v24 }
 0x1af   :  { %v219_v25 = vpop.f32.mrf.mxu1 }
 0x1b0   :  { %248 = vst [vmem:[%s410_s3 + $0x8] sm:$0xff] %v219_v25 }
 0x1b1   :  { %v317_v26 = vpop.f32.mrf.mxu1 }
 0x1b2   :  { %253 = vst [vmem:[%s410_s3 + $0x30] sm:$0xff] %v317_v26 }
 0x1b3   :  { %v232_v27 = vpop.f32.mrf.mxu1 }
 0x1b4   :  { %251 = vst [vmem:[%s410_s3 + $0x20] sm:$0xff] %v232_v27 }
 0x1b5   :  { %v318_v28 = vpop.f32.mrf.mxu1 }
 0x1b6   :  { %254 = vst [vmem:[%s410_s3 + $0x38] sm:$0xff] %v318_v28 }
 0x1b7   :  { %v235_v29 = vpop.f32.mrf.mxu1 }
 0x1b8   :  { %252 = vst [vmem:[%s410_s3 + $0x28] sm:$0xff] %v235_v29 }

</bundles_post_ra>
